<compile_context>
chip_gen: v6e
topology: v6e:2x2x1
jax: 0.10.0
libtpu: 0.0.40
codegen_flags: <defaults>
</compile_context>

<pallas_src>
import functools

import jax
import jax.numpy as jnp
from jax import lax
from jax.experimental import pallas as pl
from jax.experimental.pallas import tpu as pltpu


def _layer_norm(x, gamma, beta, eps=1e-5):
    # x: (T, D); gamma/beta: (1, D).  PyTorch LayerNorm: biased variance, eps=1e-5.
    mean = jnp.mean(x, axis=-1, keepdims=True)
    xc = x - mean
    var = jnp.mean(xc * xc, axis=-1, keepdims=True)
    inv = lax.rsqrt(var + eps)
    return xc * inv * gamma + beta


def encoder_layer_kernel(
    x_ref,
    wq_ref, bq_ref, wk_ref, bk_ref, wv_ref, bv_ref, wo_ref, bo_ref,
    w1_ref, b1_ref, w2_ref, b2_ref,
    gamma_ref, beta_ref,
    out_ref,
    k_cache, v_cache, attn_scratch,
    *, n_heads, mxu_dtype,
):
    j = pl.program_id(1)
    TQ, D = out_ref.shape
    dh = D // n_heads

    # Hoist small parameters once (JAX does not CSE broadcast_in_dim).
    bq = bq_ref[...]; bk = bk_ref[...]; bv = bv_ref[...]; bo = bo_ref[...]
    b1 = b1_ref[...]; b2 = b2_ref[...]
    gamma = gamma_ref[...]; beta = beta_ref[...]

    def mm(a, w):
        # MXU matmul: bf16 (or f32) operands, f32 accumulation.
        return jnp.dot(a.astype(mxu_dtype), w.astype(mxu_dtype),
                       preferred_element_type=jnp.float32)

    # --- K/V projection: ONCE per batch element, cached in VMEM (mxu_dtype) ---
    @pl.when(j == 0)
    def _():
        xf = x_ref[...]                                            # (S, D)
        k_cache[...] = (mm(xf, wk_ref[...]) + bk).astype(mxu_dtype)
        v_cache[...] = (mm(xf, wv_ref[...]) + bv).astype(mxu_dtype)

    # --- Query tile (also the residual-stream slice). 1/sqrt(dh) folded into
    #     wq/bq on the host, so no per-tile scale multiply here.
    qstart = pl.multiple_of(j * TQ, TQ)
    x_tile = x_ref[pl.ds(qstart, TQ), :]                           # (TQ, D) f32
    q = (mm(x_tile, wq_ref[...]) + bq).astype(mxu_dtype)           # cast once
    k = k_cache[...]                                               # (S, D) mxu_dtype
    v = v_cache[...]

    # --- Per-head attention. K^T folded into dot_general; softmax
    #     normalization applied after PV ((TQ, dh) instead of (TQ, S)); head
    #     outputs packed into (TQ, D) scratch so the out-projection is a single
    #     full-width MXU matmul.
    # TODO(synk): flash-style KV-tile loop for long S (bounded (TQ,TK) scores).
    for h in range(n_heads):
        lo = h * dh
        qh = q[:, lo:lo + dh]
        kh = k[:, lo:lo + dh]
        vh = v[:, lo:lo + dh]
        s = lax.dot_general(
            qh, kh, dimension_numbers=(((1,), (1,)), ((), ())),
            preferred_element_type=jnp.float32)                    # (TQ, S)
        m = jnp.max(s, axis=-1, keepdims=True)
        p = jnp.exp(s - m)                                         # f32 (v5e-safe)
        denom = jnp.sum(p, axis=-1, keepdims=True)
        o_h = jnp.dot(p.astype(mxu_dtype), vh,
                      preferred_element_type=jnp.float32)          # (TQ, dh)
        # EUP approximate reciprocal (inference-grade accuracy).
        o_h = o_h * pl.reciprocal(denom, approx=True)
        attn_scratch[:, lo:lo + dh] = o_h

    attn = mm(attn_scratch[...], wo_ref[...]) + bo                 # (TQ, D)

    # --- Add & Norm 1 (f32 vector math) ---
    attn_val = _layer_norm(x_tile + attn, gamma, beta)

    # --- Positionwise FeedForward ---
    h1 = jnp.maximum(mm(attn_val, w1_ref[...]) + b1, 0.0)
    h2 = mm(h1, w2_ref[...]) + b2

    # --- Add & Norm 2 ---
    out_ref[...] = _layer_norm(attn_val + h2, gamma, beta).astype(out_ref.dtype)


def encoder_layer(x, params, n_heads, *, block_q=256, mxu_dtype=jnp.bfloat16):
    """x: (B, S, D).  params: dict of f32 weights (see __main__)."""
    B, S, D = x.shape
    d_ff = params["w1"].shape[1]
    assert D % n_heads == 0, "d_model must be divisible by n_heads"
    dh = D // n_heads

    TQ = min(block_q, S)
    assert S % TQ == 0, "seq_len must be divisible by the query tile size"
    n_qt = S // TQ

    # Fold the 1/sqrt(dh) attention scale into wq/bq on the host (free).
    scale = 1.0 / (dh ** 0.5)
    f32 = jnp.float32
    wq = (params["wq"] * scale).astype(mxu_dtype)
    bq = (params["bq"] * scale).astype(f32)
    wk = params["wk"].astype(mxu_dtype); bk = params["bk"].astype(f32)
    wv = params["wv"].astype(mxu_dtype); bv = params["bv"].astype(f32)
    wo = params["wo"].astype(mxu_dtype); bo = params["bo"].astype(f32)
    w1 = params["w1"].astype(mxu_dtype); b1 = params["b1"].astype(f32)
    w2 = params["w2"].astype(mxu_dtype); b2 = params["b2"].astype(f32)
    gamma = params["gamma"].astype(f32); beta = params["beta"].astype(f32)

    # Constant-block-index operands: single-buffered (no dead double-buffer VMEM).
    def const_spec(shape):
        return pl.BlockSpec(shape, lambda b, j: tuple(0 for _ in shape),
                            pipeline_mode=pl.Buffered(1))

    in_specs = [
        # x: full (S, D) slab per batch element (K/V source + residual/query
        # tiles); block index changes only with b, default double-buffering
        # lets the next b's slab prefetch overlap the current b's tail tiles.
        pl.BlockSpec((None, S, D), lambda b, j: (b, 0, 0)),
        const_spec((D, D)), const_spec((1, D)),        # wq, bq
        const_spec((D, D)), const_spec((1, D)),        # wk, bk
        const_spec((D, D)), const_spec((1, D)),        # wv, bv
        const_spec((D, D)), const_spec((1, D)),        # wo, bo
        const_spec((D, d_ff)), const_spec((1, d_ff)),  # w1, b1
        const_spec((d_ff, D)), const_spec((1, D)),     # w2, b2
        const_spec((1, D)), const_spec((1, D)),        # gamma, beta
    ]

    # Generation-aware VMEM budget: ~85% of physical capacity, capped at
    # 112 MiB (v7x: ~54 MiB of 64; v5e/v6e: ~108 MiB of 128).
    try:
        info = pltpu.get_tpu_info()
        vmem_cap = int(getattr(info, "vmem_capacity_bytes", 128 * 1024 * 1024))
    except Exception:
        vmem_cap = 128 * 1024 * 1024
    vmem_limit = max(32 * 1024 * 1024,
                     min(int(vmem_cap * 0.85), 112 * 1024 * 1024))

    kernel = functools.partial(
        encoder_layer_kernel, n_heads=n_heads, mxu_dtype=mxu_dtype)

    return pl.pallas_call(
        kernel,
        out_shape=jax.ShapeDtypeStruct((B, S, D), x.dtype),
        grid_spec=pltpu.PrefetchScalarGridSpec(
            num_scalar_prefetch=0,
            grid=(B, n_qt),
            in_specs=in_specs,
            out_specs=pl.BlockSpec((None, TQ, D), lambda b, j: (b, j, 0)),
            scratch_shapes=[
                pltpu.VMEM((S, D), mxu_dtype),      # K cache (per batch element)
                pltpu.VMEM((S, D), mxu_dtype),      # V cache
                pltpu.VMEM((TQ, D), jnp.float32),   # packed head outputs
            ],
        ),
        compiler_params=pltpu.CompilerParams(
            # b: megacore-parallel; j must be "arbitrary" because the K/V cache
            # scratch is filled at j == 0 and reused by later query tiles.
            dimension_semantics=("parallel", "arbitrary"),
            vmem_limit_bytes=vmem_limit,
        ),
    )(
        x,
        wq, bq, wk, bk, wv, bv, wo, bo,
        w1, b1, w2, b2, gamma, beta,
    )


def encoder_layer_ref(x, p, n_heads):
    """Pure-JAX (f32) reference for correctness check."""
    B, S, D = x.shape
    dh = D // n_heads

    def ln(y):
        m = jnp.mean(y, axis=-1, keepdims=True)
        v = jnp.mean((y - m) ** 2, axis=-1, keepdims=True)
        return (y - m) / jnp.sqrt(v + 1e-5) * p["gamma"] + p["beta"]

    q = x @ p["wq"] + p["bq"]
    k = x @ p["wk"] + p["bk"]
    v = x @ p["wv"] + p["bv"]
    q = q.reshape(B, S, n_heads, dh).transpose(0, 2, 1, 3)
    k = k.reshape(B, S, n_heads, dh).transpose(0, 2, 1, 3)
    v = v.reshape(B, S, n_heads, dh).transpose(0, 2, 1, 3)
    scores = jnp.einsum("bhqd,bhkd->bhqk", q, k) / jnp.sqrt(dh)
    attn = jax.nn.softmax(scores, axis=-1)
    o = jnp.einsum("bhqk,bhkd->bhqd", attn, v).transpose(0, 2, 1, 3).reshape(B, S, D)
    o = o @ p["wo"] + p["bo"]
    attn_val = ln(x + o)
    h = jnp.maximum(attn_val @ p["w1"] + p["b1"], 0.0)
    h = h @ p["w2"] + p["b2"]
    return ln(attn_val + h)


if __name__ == "__main__":
    B, S, D, D_FF, N_HEADS = 2, 16, 32, 64, 4

    key = jax.random.PRNGKey(0)
    keys = jax.random.split(key, 8)

    def w(k, shape, scale=0.05):
        return (scale * jax.random.normal(k, shape)).astype(jnp.float32)

    params = {
        "wq": w(keys[0], (D, D)), "bq": jnp.zeros((1, D), jnp.float32),
        "wk": w(keys[1], (D, D)), "bk": jnp.zeros((1, D), jnp.float32),
        "wv": w(keys[2], (D, D)), "bv": jnp.zeros((1, D), jnp.float32),
        "wo": w(keys[3], (D, D)), "bo": jnp.zeros((1, D), jnp.float32),
        "w1": w(keys[4], (D, D_FF)), "b1": jnp.full((1, D_FF), 0.01, jnp.float32),
        "w2": w(keys[5], (D_FF, D)), "b2": jnp.full((1, D), 0.01, jnp.float32),
        "gamma": jnp.ones((1, D), jnp.float32),
        "beta": jnp.zeros((1, D), jnp.float32),
    }

    x = jax.random.normal(keys[6], (B, S, D), dtype=jnp.float32)

    ref = encoder_layer_ref(x, params, N_HEADS)

    # f32 MXU path: tight tolerance (approx reciprocal is the only deviation).
    # block_q=8 exercises multi-tile queries + the cached K/V reuse across j.
    out_f32 = jax.block_until_ready(
        encoder_layer(x, params, N_HEADS, block_q=8, mxu_dtype=jnp.float32))
    assert out_f32.shape == (B, S, D)
    assert jnp.allclose(out_f32, ref, atol=2e-3, rtol=2e-3), "f32 path mismatch"

    # Default bf16-MXU / bf16-weight path (native MXU rate on v5e/v6e/v7x).
    out_bf16 = jax.block_until_ready(
        encoder_layer(x, params, N_HEADS, block_q=8))
    assert out_bf16.shape == (B, S, D)
    # Wider tolerance accounts for bf16 weight/operand rounding in the MXU path.
    assert jnp.allclose(out_bf16, ref, atol=5e-2, rtol=5e-2), "bf16 path mismatch"

    print("KERNEL_OK")
</pallas_src>

<mosaic_0001>
module attributes {stable_mosaic.version = 11 : i64} {
  func.func @encoder_layer_kernel(%arg0: i32, %arg1: i32, %arg2: memref<1x16x32xf32, #tpu.memory_space<vmem>>, %arg3: memref<32x32xf32, #tpu.memory_space<vmem>>, %arg4: memref<1x32xf32, #tpu.memory_space<vmem>>, %arg5: memref<32x32xf32, #tpu.memory_space<vmem>>, %arg6: memref<1x32xf32, #tpu.memory_space<vmem>>, %arg7: memref<32x32xf32, #tpu.memory_space<vmem>>, %arg8: memref<1x32xf32, #tpu.memory_space<vmem>>, %arg9: memref<32x32xf32, #tpu.memory_space<vmem>>, %arg10: memref<1x32xf32, #tpu.memory_space<vmem>>, %arg11: memref<32x64xf32, #tpu.memory_space<vmem>>, %arg12: memref<1x64xf32, #tpu.memory_space<vmem>>, %arg13: memref<64x32xf32, #tpu.memory_space<vmem>>, %arg14: memref<1x32xf32, #tpu.memory_space<vmem>>, %arg15: memref<1x32xf32, #tpu.memory_space<vmem>>, %arg16: memref<1x32xf32, #tpu.memory_space<vmem>>, %arg17: memref<1x8x32xf32, #tpu.memory_space<vmem>>, %arg18: memref<16x32xf32, #tpu.memory_space<vmem>>, %arg19: memref<16x32xf32, #tpu.memory_space<vmem>>, %arg20: memref<8x32xf32, #tpu.memory_space<vmem>>) attributes {dimension_semantics = [#tpu.dimension_semantics<parallel>, #tpu.dimension_semantics<arbitrary>], iteration_bounds = array<i64: 2, 2>, scalar_prefetch = 0 : i64, scratch_operands = 3 : i64, tpu.core_type = #tpu.core_type<tc>, window_params = [{transform_indices = @transform_0, window_bounds = array<i64: 1, 16, 32>}, {pipeline_mode = #tpu.pipeline_mode<synchronous>, transform_indices = @transform_1, window_bounds = array<i64: 32, 32>}, {pipeline_mode = #tpu.pipeline_mode<synchronous>, transform_indices = @transform_2, window_bounds = array<i64: 1, 32>}, {pipeline_mode = #tpu.pipeline_mode<synchronous>, transform_indices = @transform_3, window_bounds = array<i64: 32, 32>}, {pipeline_mode = #tpu.pipeline_mode<synchronous>, transform_indices = @transform_4, window_bounds = array<i64: 1, 32>}, {pipeline_mode = #tpu.pipeline_mode<synchronous>, transform_indices = @transform_5, window_bounds = array<i64: 32, 32>}, {pipeline_mode = #tpu.pipeline_mode<synchronous>, transform_indices = @transform_6, window_bounds = array<i64: 1, 32>}, {pipeline_mode = #tpu.pipeline_mode<synchronous>, transform_indices = @transform_7, window_bounds = array<i64: 32, 32>}, {pipeline_mode = #tpu.pipeline_mode<synchronous>, transform_indices = @transform_8, window_bounds = array<i64: 1, 32>}, {pipeline_mode = #tpu.pipeline_mode<synchronous>, transform_indices = @transform_9, window_bounds = array<i64: 32, 64>}, {pipeline_mode = #tpu.pipeline_mode<synchronous>, transform_indices = @transform_10, window_bounds = array<i64: 1, 64>}, {pipeline_mode = #tpu.pipeline_mode<synchronous>, transform_indices = @transform_11, window_bounds = array<i64: 64, 32>}, {pipeline_mode = #tpu.pipeline_mode<synchronous>, transform_indices = @transform_12, window_bounds = array<i64: 1, 32>}, {pipeline_mode = #tpu.pipeline_mode<synchronous>, transform_indices = @transform_13, window_bounds = array<i64: 1, 32>}, {pipeline_mode = #tpu.pipeline_mode<synchronous>, transform_indices = @transform_14, window_bounds = array<i64: 1, 32>}, {transform_indices = @transform_15, window_bounds = array<i64: 1, 8, 32>}]} {
    %c0 = arith.constant 0 : index
    %c0_0 = arith.constant 0 : index
    %0 = vector.load %arg4[%c0, %c0_0] : memref<1x32xf32, #tpu.memory_space<vmem>>, vector<1x32xf32>
    %c0_1 = arith.constant 0 : index
    %c0_2 = arith.constant 0 : index
    %1 = vector.load %arg6[%c0_1, %c0_2] : memref<1x32xf32, #tpu.memory_space<vmem>>, vector<1x32xf32>
    %c0_3 = arith.constant 0 : index
    %c0_4 = arith.constant 0 : index
    %2 = vector.load %arg8[%c0_3, %c0_4] : memref<1x32xf32, #tpu.memory_space<vmem>>, vector<1x32xf32>
    %c0_5 = arith.constant 0 : index
    %c0_6 = arith.constant 0 : index
    %3 = vector.load %arg10[%c0_5, %c0_6] : memref<1x32xf32, #tpu.memory_space<vmem>>, vector<1x32xf32>
    %c0_7 = arith.constant 0 : index
    %c0_8 = arith.constant 0 : index
    %4 = vector.load %arg12[%c0_7, %c0_8] : memref<1x64xf32, #tpu.memory_space<vmem>>, vector<1x64xf32>
    %c0_9 = arith.constant 0 : index
    %c0_10 = arith.constant 0 : index
    %5 = vector.load %arg14[%c0_9, %c0_10] : memref<1x32xf32, #tpu.memory_space<vmem>>, vector<1x32xf32>
    %c0_11 = arith.constant 0 : index
    %c0_12 = arith.constant 0 : index
    %6 = vector.load %arg15[%c0_11, %c0_12] : memref<1x32xf32, #tpu.memory_space<vmem>>, vector<1x32xf32>
    %c0_13 = arith.constant 0 : index
    %c0_14 = arith.constant 0 : index
    %7 = vector.load %arg16[%c0_13, %c0_14] : memref<1x32xf32, #tpu.memory_space<vmem>>, vector<1x32xf32>
    %c0_i32 = arith.constant 0 : i32
    %8 = arith.cmpi eq, %arg1, %c0_i32 : i32
    %9 = arith.extui %8 : i1 to i32
    %c0_i32_15 = arith.constant 0 : i32
    %10 = arith.cmpi ne, %9, %c0_i32_15 : i32
    scf.if %10 {
      %c0_70 = arith.constant 0 : index
      %c0_71 = arith.constant 0 : index
      %c0_72 = arith.constant 0 : index
      %146 = vector.load %arg2[%c0_70, %c0_71, %c0_72] : memref<1x16x32xf32, #tpu.memory_space<vmem>>, vector<1x16x32xf32>
      %147 = vector.shape_cast %146 : vector<1x16x32xf32> to vector<16x32xf32>
      %c0_73 = arith.constant 0 : index
      %c0_74 = arith.constant 0 : index
      %148 = vector.load %arg5[%c0_73, %c0_74] : memref<32x32xf32, #tpu.memory_space<vmem>>, vector<32x32xf32>
      %cst_75 = arith.constant dense<0.000000e+00> : vector<16x32xf32>
      %149 = tpu.matmul %147, %148, %cst_75 {dimension_numbers = #tpu.dot_dimension_numbers<[1], [0], [0], [1], [0, 0, 1, 1], [], []>} : vector<16x32xf32>, vector<32x32xf32>, vector<16x32xf32> -> vector<16x32xf32>
      %150 = vector.broadcast %1 : vector<1x32xf32> to vector<16x32xf32>
      %151 = arith.addf %149, %150 : vector<16x32xf32>
      %c0_76 = arith.constant 0 : index
      %c0_77 = arith.constant 0 : index
      %152 = vector.load %arg18[%c0_76, %c0_77] : memref<16x32xf32, #tpu.memory_space<vmem>>, vector<16x32xf32>
      tpu.vector_store %arg18[%c0_76, %c0_77], %151 {strides = array<i32>} : memref<16x32xf32, #tpu.memory_space<vmem>>, vector<16x32xf32>,
      %c0_78 = arith.constant 0 : index
      %c0_79 = arith.constant 0 : index
      %153 = vector.load %arg7[%c0_78, %c0_79] : memref<32x32xf32, #tpu.memory_space<vmem>>, vector<32x32xf32>
      %cst_80 = arith.constant dense<0.000000e+00> : vector<16x32xf32>
      %154 = tpu.matmul %147, %153, %cst_80 {dimension_numbers = #tpu.dot_dimension_numbers<[1], [0], [0], [1], [0, 0, 1, 1], [], []>} : vector<16x32xf32>, vector<32x32xf32>, vector<16x32xf32> -> vector<16x32xf32>
      %155 = vector.broadcast %2 : vector<1x32xf32> to vector<16x32xf32>
      %156 = arith.addf %154, %155 : vector<16x32xf32>
      %c0_81 = arith.constant 0 : index
      %c0_82 = arith.constant 0 : index
      %157 = vector.load %arg19[%c0_81, %c0_82] : memref<16x32xf32, #tpu.memory_space<vmem>>, vector<16x32xf32>
      tpu.vector_store %arg19[%c0_81, %c0_82], %156 {strides = array<i32>} : memref<16x32xf32, #tpu.memory_space<vmem>>, vector<16x32xf32>,
    } else {
    }
    %c8_i32 = arith.constant 8 : i32
    %11 = arith.muli %arg1, %c8_i32 : i32
    %12 = tpu.assume_multiple %11, 8 : i32
    %c0_16 = arith.constant 0 : index
    %13 = arith.index_cast %12 : i32 to index
    %c0_17 = arith.constant 0 : index
    %14 = vector.load %arg2[%c0_16, %13, %c0_17] : memref<1x16x32xf32, #tpu.memory_space<vmem>>, vector<1x8x32xf32>
    %15 = vector.shape_cast %14 : vector<1x8x32xf32> to vector<8x32xf32>
    %c0_18 = arith.constant 0 : index
    %c0_19 = arith.constant 0 : index
    %16 = vector.load %arg3[%c0_18, %c0_19] : memref<32x32xf32, #tpu.memory_space<vmem>>, vector<32x32xf32>
    %cst = arith.constant dense<0.000000e+00> : vector<8x32xf32>
    %17 = tpu.matmul %15, %16, %cst {dimension_numbers = #tpu.dot_dimension_numbers<[1], [0], [0], [1], [0, 0, 1, 1], [], []>} : vector<8x32xf32>, vector<32x32xf32>, vector<8x32xf32> -> vector<8x32xf32>
    %18 = vector.broadcast %0 : vector<1x32xf32> to vector<8x32xf32>
    %19 = arith.addf %17, %18 : vector<8x32xf32>
    %c0_20 = arith.constant 0 : index
    %c0_21 = arith.constant 0 : index
    %20 = vector.load %arg18[%c0_20, %c0_21] : memref<16x32xf32, #tpu.memory_space<vmem>>, vector<16x32xf32>
    %c0_22 = arith.constant 0 : index
    %c0_23 = arith.constant 0 : index
    %21 = vector.load %arg19[%c0_22, %c0_23] : memref<16x32xf32, #tpu.memory_space<vmem>>, vector<16x32xf32>
    %22 = vector.extract_strided_slice %19 {offsets = [0, 0], sizes = [8, 8], strides = [1, 1]} : vector<8x32xf32> to vector<8x8xf32>
    %23 = vector.extract_strided_slice %20 {offsets = [0, 0], sizes = [16, 8], strides = [1, 1]} : vector<16x32xf32> to vector<16x8xf32>
    %24 = vector.extract_strided_slice %21 {offsets = [0, 0], sizes = [16, 8], strides = [1, 1]} : vector<16x32xf32> to vector<16x8xf32>
    %cst_24 = arith.constant dense<0.000000e+00> : vector<8x16xf32>
    %25 = tpu.matmul %22, %23, %cst_24 {dimension_numbers = #tpu.dot_dimension_numbers<[1], [1], [0], [0], [0, 0, 1, 0], [], []>} : vector<8x8xf32>, vector<16x8xf32>, vector<8x16xf32> -> vector<8x16xf32>
    %cst_25 = arith.constant dense<0xFF800000> : vector<8xf32>
    %26 = vector.multi_reduction <maximumf>, %25, %cst_25 [1] : vector<8x16xf32> to vector<8xf32>
    %27 = vector.shape_cast %26 : vector<8xf32> to vector<8x1xf32>
    %28 = vector.broadcast %27 : vector<8x1xf32> to vector<8x16xf32>
    %29 = arith.subf %25, %28 : vector<8x16xf32>
    %30 = math.exp %29 : vector<8x16xf32>
    %cst_26 = arith.constant dense<0.000000e+00> : vector<8xf32>
    %31 = vector.multi_reduction <add>, %30, %cst_26 [1] : vector<8x16xf32> to vector<8xf32>
    %32 = vector.shape_cast %31 : vector<8xf32> to vector<8x1xf32>
    %cst_27 = arith.constant dense<0.000000e+00> : vector<8x8xf32>
    %33 = tpu.matmul %30, %24, %cst_27 {dimension_numbers = #tpu.dot_dimension_numbers<[1], [0], [0], [1], [0, 0, 1, 1], [], []>} : vector<8x16xf32>, vector<16x8xf32>, vector<8x8xf32> -> vector<8x8xf32>
    %34 = tpu.reciprocal %32 {approx = true} : vector<8x1xf32> -> vector<8x1xf32>
    %35 = vector.broadcast %34 : vector<8x1xf32> to vector<8x8xf32>
    %36 = arith.mulf %33, %35 : vector<8x8xf32>
    %c0_28 = arith.constant 0 : index
    %c0_29 = arith.constant 0 : index
    %37 = vector.load %arg20[%c0_28, %c0_29] : memref<8x32xf32, #tpu.memory_space<vmem>>, vector<8x8xf32>
    tpu.vector_store %arg20[%c0_28, %c0_29], %36 {strides = array<i32>} : memref<8x32xf32, #tpu.memory_space<vmem>>, vector<8x8xf32>,
    %38 = vector.extract_strided_slice %19 {offsets = [0, 8], sizes = [8, 8], strides = [1, 1]} : vector<8x32xf32> to vector<8x8xf32>
    %39 = vector.extract_strided_slice %20 {offsets = [0, 8], sizes = [16, 8], strides = [1, 1]} : vector<16x32xf32> to vector<16x8xf32>
    %40 = vector.extract_strided_slice %21 {offsets = [0, 8], sizes = [16, 8], strides = [1, 1]} : vector<16x32xf32> to vector<16x8xf32>
    %cst_30 = arith.constant dense<0.000000e+00> : vector<8x16xf32>
    %41 = tpu.matmul %38, %39, %cst_30 {dimension_numbers = #tpu.dot_dimension_numbers<[1], [1], [0], [0], [0, 0, 1, 0], [], []>} : vector<8x8xf32>, vector<16x8xf32>, vector<8x16xf32> -> vector<8x16xf32>
    %cst_31 = arith.constant dense<0xFF800000> : vector<8xf32>
    %42 = vector.multi_reduction <maximumf>, %41, %cst_31 [1] : vector<8x16xf32> to vector<8xf32>
    %43 = vector.shape_cast %42 : vector<8xf32> to vector<8x1xf32>
    %44 = vector.broadcast %43 : vector<8x1xf32> to vector<8x16xf32>
    %45 = arith.subf %41, %44 : vector<8x16xf32>
    %46 = math.exp %45 : vector<8x16xf32>
    %cst_32 = arith.constant dense<0.000000e+00> : vector<8xf32>
    %47 = vector.multi_reduction <add>, %46, %cst_32 [1] : vector<8x16xf32> to vector<8xf32>
    %48 = vector.shape_cast %47 : vector<8xf32> to vector<8x1xf32>
    %cst_33 = arith.constant dense<0.000000e+00> : vector<8x8xf32>
    %49 = tpu.matmul %46, %40, %cst_33 {dimension_numbers = #tpu.dot_dimension_numbers<[1], [0], [0], [1], [0, 0, 1, 1], [], []>} : vector<8x16xf32>, vector<16x8xf32>, vector<8x8xf32> -> vector<8x8xf32>
    %50 = tpu.reciprocal %48 {approx = true} : vector<8x1xf32> -> vector<8x1xf32>
    %51 = vector.broadcast %50 : vector<8x1xf32> to vector<8x8xf32>
    %52 = arith.mulf %49, %51 : vector<8x8xf32>
    %c0_34 = arith.constant 0 : index
    %c8 = arith.constant 8 : index
    %53 = vector.load %arg20[%c0_34, %c8] : memref<8x32xf32, #tpu.memory_space<vmem>>, vector<8x8xf32>
    tpu.vector_store %arg20[%c0_34, %c8], %52 {strides = array<i32>} : memref<8x32xf32, #tpu.memory_space<vmem>>, vector<8x8xf32>,
    %54 = vector.extract_strided_slice %19 {offsets = [0, 16], sizes = [8, 8], strides = [1, 1]} : vector<8x32xf32> to vector<8x8xf32>
    %55 = vector.extract_strided_slice %20 {offsets = [0, 16], sizes = [16, 8], strides = [1, 1]} : vector<16x32xf32> to vector<16x8xf32>
    %56 = vector.extract_strided_slice %21 {offsets = [0, 16], sizes = [16, 8], strides = [1, 1]} : vector<16x32xf32> to vector<16x8xf32>
    %cst_35 = arith.constant dense<0.000000e+00> : vector<8x16xf32>
    %57 = tpu.matmul %54, %55, %cst_35 {dimension_numbers = #tpu.dot_dimension_numbers<[1], [1], [0], [0], [0, 0, 1, 0], [], []>} : vector<8x8xf32>, vector<16x8xf32>, vector<8x16xf32> -> vector<8x16xf32>
    %cst_36 = arith.constant dense<0xFF800000> : vector<8xf32>
    %58 = vector.multi_reduction <maximumf>, %57, %cst_36 [1] : vector<8x16xf32> to vector<8xf32>
    %59 = vector.shape_cast %58 : vector<8xf32> to vector<8x1xf32>
    %60 = vector.broadcast %59 : vector<8x1xf32> to vector<8x16xf32>
    %61 = arith.subf %57, %60 : vector<8x16xf32>
    %62 = math.exp %61 : vector<8x16xf32>
    %cst_37 = arith.constant dense<0.000000e+00> : vector<8xf32>
    %63 = vector.multi_reduction <add>, %62, %cst_37 [1] : vector<8x16xf32> to vector<8xf32>
    %64 = vector.shape_cast %63 : vector<8xf32> to vector<8x1xf32>
    %cst_38 = arith.constant dense<0.000000e+00> : vector<8x8xf32>
    %65 = tpu.matmul %62, %56, %cst_38 {dimension_numbers = #tpu.dot_dimension_numbers<[1], [0], [0], [1], [0, 0, 1, 1], [], []>} : vector<8x16xf32>, vector<16x8xf32>, vector<8x8xf32> -> vector<8x8xf32>
    %66 = tpu.reciprocal %64 {approx = true} : vector<8x1xf32> -> vector<8x1xf32>
    %67 = vector.broadcast %66 : vector<8x1xf32> to vector<8x8xf32>
    %68 = arith.mulf %65, %67 : vector<8x8xf32>
    %c0_39 = arith.constant 0 : index
    %c16 = arith.constant 16 : index
    %69 = vector.load %arg20[%c0_39, %c16] : memref<8x32xf32, #tpu.memory_space<vmem>>, vector<8x8xf32>
    tpu.vector_store %arg20[%c0_39, %c16], %68 {strides = array<i32>} : memref<8x32xf32, #tpu.memory_space<vmem>>, vector<8x8xf32>,
    %70 = vector.extract_strided_slice %19 {offsets = [0, 24], sizes = [8, 8], strides = [1, 1]} : vector<8x32xf32> to vector<8x8xf32>
    %71 = vector.extract_strided_slice %20 {offsets = [0, 24], sizes = [16, 8], strides = [1, 1]} : vector<16x32xf32> to vector<16x8xf32>
    %72 = vector.extract_strided_slice %21 {offsets = [0, 24], sizes = [16, 8], strides = [1, 1]} : vector<16x32xf32> to vector<16x8xf32>
    %cst_40 = arith.constant dense<0.000000e+00> : vector<8x16xf32>
    %73 = tpu.matmul %70, %71, %cst_40 {dimension_numbers = #tpu.dot_dimension_numbers<[1], [1], [0], [0], [0, 0, 1, 0], [], []>} : vector<8x8xf32>, vector<16x8xf32>, vector<8x16xf32> -> vector<8x16xf32>
    %cst_41 = arith.constant dense<0xFF800000> : vector<8xf32>
    %74 = vector.multi_reduction <maximumf>, %73, %cst_41 [1] : vector<8x16xf32> to vector<8xf32>
    %75 = vector.shape_cast %74 : vector<8xf32> to vector<8x1xf32>
    %76 = vector.broadcast %75 : vector<8x1xf32> to vector<8x16xf32>
    %77 = arith.subf %73, %76 : vector<8x16xf32>
    %78 = math.exp %77 : vector<8x16xf32>
    %cst_42 = arith.constant dense<0.000000e+00> : vector<8xf32>
    %79 = vector.multi_reduction <add>, %78, %cst_42 [1] : vector<8x16xf32> to vector<8xf32>
    %80 = vector.shape_cast %79 : vector<8xf32> to vector<8x1xf32>
    %cst_43 = arith.constant dense<0.000000e+00> : vector<8x8xf32>
    %81 = tpu.matmul %78, %72, %cst_43 {dimension_numbers = #tpu.dot_dimension_numbers<[1], [0], [0], [1], [0, 0, 1, 1], [], []>} : vector<8x16xf32>, vector<16x8xf32>, vector<8x8xf32> -> vector<8x8xf32>
    %82 = tpu.reciprocal %80 {approx = true} : vector<8x1xf32> -> vector<8x1xf32>
    %83 = vector.broadcast %82 : vector<8x1xf32> to vector<8x8xf32>
    %84 = arith.mulf %81, %83 : vector<8x8xf32>
    %c0_44 = arith.constant 0 : index
    %c24 = arith.constant 24 : index
    %85 = vector.load %arg20[%c0_44, %c24] : memref<8x32xf32, #tpu.memory_space<vmem>>, vector<8x8xf32>
    tpu.vector_store %arg20[%c0_44, %c24], %84 {strides = array<i32>} : memref<8x32xf32, #tpu.memory_space<vmem>>, vector<8x8xf32>,
    %c0_45 = arith.constant 0 : index
    %c0_46 = arith.constant 0 : index
    %86 = vector.load %arg20[%c0_45, %c0_46] : memref<8x32xf32, #tpu.memory_space<vmem>>, vector<8x32xf32>
    %c0_47 = arith.constant 0 : index
    %c0_48 = arith.constant 0 : index
    %87 = vector.load %arg9[%c0_47, %c0_48] : memref<32x32xf32, #tpu.memory_space<vmem>>, vector<32x32xf32>
    %cst_49 = arith.constant dense<0.000000e+00> : vector<8x32xf32>
    %88 = tpu.matmul %86, %87, %cst_49 {dimension_numbers = #tpu.dot_dimension_numbers<[1], [0], [0], [1], [0, 0, 1, 1], [], []>} : vector<8x32xf32>, vector<32x32xf32>, vector<8x32xf32> -> vector<8x32xf32>
    %89 = vector.broadcast %3 : vector<1x32xf32> to vector<8x32xf32>
    %90 = arith.addf %88, %89 : vector<8x32xf32>
    %91 = arith.addf %15, %90 : vector<8x32xf32>
    %cst_50 = arith.constant dense<0.000000e+00> : vector<8xf32>
    %92 = vector.multi_reduction <add>, %91, %cst_50 [1] : vector<8x32xf32> to vector<8xf32>
    %93 = vector.shape_cast %92 : vector<8xf32> to vector<8x1xf32>
    %cst_51 = arith.constant 3.200000e+01 : f32
    %94 = vector.broadcast %cst_51 : f32 to vector<8x1xf32>
    %95 = arith.divf %93, %94 : vector<8x1xf32>
    %96 = vector.broadcast %95 : vector<8x1xf32> to vector<8x32xf32>
    %97 = arith.subf %91, %96 : vector<8x32xf32>
    %98 = arith.mulf %97, %97 : vector<8x32xf32>
    %cst_52 = arith.constant dense<0.000000e+00> : vector<8xf32>
    %99 = vector.multi_reduction <add>, %98, %cst_52 [1] : vector<8x32xf32> to vector<8xf32>
    %100 = vector.shape_cast %99 : vector<8xf32> to vector<8x1xf32>
    %cst_53 = arith.constant 3.200000e+01 : f32
    %101 = vector.broadcast %cst_53 : f32 to vector<8x1xf32>
    %102 = arith.divf %100, %101 : vector<8x1xf32>
    %cst_54 = arith.constant 9.99999974E-6 : f32
    %103 = vector.broadcast %cst_54 : f32 to vector<8x1xf32>
    %104 = arith.addf %102, %103 : vector<8x1xf32>
    %105 = math.rsqrt %104 : vector<8x1xf32>
    %106 = vector.broadcast %105 : vector<8x1xf32> to vector<8x32xf32>
    %107 = arith.mulf %97, %106 : vector<8x32xf32>
    %108 = vector.broadcast %6 : vector<1x32xf32> to vector<8x32xf32>
    %109 = arith.mulf %107, %108 : vector<8x32xf32>
    %110 = vector.broadcast %7 : vector<1x32xf32> to vector<8x32xf32>
    %111 = arith.addf %109, %110 : vector<8x32xf32>
    %c0_55 = arith.constant 0 : index
    %c0_56 = arith.constant 0 : index
    %112 = vector.load %arg11[%c0_55, %c0_56] : memref<32x64xf32, #tpu.memory_space<vmem>>, vector<32x64xf32>
    %cst_57 = arith.constant dense<0.000000e+00> : vector<8x64xf32>
    %113 = tpu.matmul %111, %112, %cst_57 {dimension_numbers = #tpu.dot_dimension_numbers<[1], [0], [0], [1], [0, 0, 1, 1], [], []>} : vector<8x32xf32>, vector<32x64xf32>, vector<8x64xf32> -> vector<8x64xf32>
    %114 = vector.broadcast %4 : vector<1x64xf32> to vector<8x64xf32>
    %115 = arith.addf %113, %114 : vector<8x64xf32>
    %cst_58 = arith.constant 0.000000e+00 : f32
    %116 = vector.broadcast %cst_58 : f32 to vector<8x64xf32>
    %117 = arith.maximumf %115, %116 : vector<8x64xf32>
    %c0_59 = arith.constant 0 : index
    %c0_60 = arith.constant 0 : index
    %118 = vector.load %arg13[%c0_59, %c0_60] : memref<64x32xf32, #tpu.memory_space<vmem>>, vector<64x32xf32>
    %cst_61 = arith.constant dense<0.000000e+00> : vector<8x32xf32>
    %119 = tpu.matmul %117, %118, %cst_61 {dimension_numbers = #tpu.dot_dimension_numbers<[1], [0], [0], [1], [0, 0, 1, 1], [], []>} : vector<8x64xf32>, vector<64x32xf32>, vector<8x32xf32> -> vector<8x32xf32>
    %120 = vector.broadcast %5 : vector<1x32xf32> to vector<8x32xf32>
    %121 = arith.addf %119, %120 : vector<8x32xf32>
    %122 = arith.addf %111, %121 : vector<8x32xf32>
    %cst_62 = arith.constant dense<0.000000e+00> : vector<8xf32>
    %123 = vector.multi_reduction <add>, %122, %cst_62 [1] : vector<8x32xf32> to vector<8xf32>
    %124 = vector.shape_cast %123 : vector<8xf32> to vector<8x1xf32>
    %cst_63 = arith.constant 3.200000e+01 : f32
    %125 = vector.broadcast %cst_63 : f32 to vector<8x1xf32>
    %126 = arith.divf %124, %125 : vector<8x1xf32>
    %127 = vector.broadcast %126 : vector<8x1xf32> to vector<8x32xf32>
    %128 = arith.subf %122, %127 : vector<8x32xf32>
    %129 = arith.mulf %128, %128 : vector<8x32xf32>
    %cst_64 = arith.constant dense<0.000000e+00> : vector<8xf32>
    %130 = vector.multi_reduction <add>, %129, %cst_64 [1] : vector<8x32xf32> to vector<8xf32>
    %131 = vector.shape_cast %130 : vector<8xf32> to vector<8x1xf32>
    %cst_65 = arith.constant 3.200000e+01 : f32
    %132 = vector.broadcast %cst_65 : f32 to vector<8x1xf32>
    %133 = arith.divf %131, %132 : vector<8x1xf32>
    %cst_66 = arith.constant 9.99999974E-6 : f32
    %134 = vector.broadcast %cst_66 : f32 to vector<8x1xf32>
    %135 = arith.addf %133, %134 : vector<8x1xf32>
    %136 = math.rsqrt %135 : vector<8x1xf32>
    %137 = vector.broadcast %136 : vector<8x1xf32> to vector<8x32xf32>
    %138 = arith.mulf %128, %137 : vector<8x32xf32>
    %139 = vector.broadcast %6 : vector<1x32xf32> to vector<8x32xf32>
    %140 = arith.mulf %138, %139 : vector<8x32xf32>
    %141 = vector.broadcast %7 : vector<1x32xf32> to vector<8x32xf32>
    %142 = arith.addf %140, %141 : vector<8x32xf32>
    %c0_67 = arith.constant 0 : index
    %c0_68 = arith.constant 0 : index
    %c0_69 = arith.constant 0 : index
    %143 = vector.load %arg17[%c0_67, %c0_68, %c0_69] : memref<1x8x32xf32, #tpu.memory_space<vmem>>, vector<1x8x32xf32>
    %144 = vector.shape_cast %143 : vector<1x8x32xf32> to vector<8x32xf32>
    %145 = vector.shape_cast %142 : vector<8x32xf32> to vector<1x8x32xf32>
    tpu.vector_store %arg17[%c0_67, %c0_68, %c0_69], %145 {strides = array<i32>} : memref<1x8x32xf32, #tpu.memory_space<vmem>>, vector<1x8x32xf32>,
    return
  }
  func.func @transform_0(%arg0: i32, %arg1: i32) -> (i32, i32, i32) {
    %c0_i32 = arith.constant 0 : i32
    %c0_i32_0 = arith.constant 0 : i32
    %c0_i32_1 = arith.constant 0 : i32
    return %arg0, %c0_i32, %c0_i32_0 : i32, i32, i32
  }
  func.func @transform_1(%arg0: i32, %arg1: i32) -> (i32, i32) {
    %c0_i32 = arith.constant 0 : i32
    %c0_i32_0 = arith.constant 0 : i32
    %c0_i32_1 = arith.constant 0 : i32
    return %c0_i32, %c0_i32_0 : i32, i32
  }
  func.func @transform_2(%arg0: i32, %arg1: i32) -> (i32, i32) {
    %c0_i32 = arith.constant 0 : i32
    %c0_i32_0 = arith.constant 0 : i32
    %c0_i32_1 = arith.constant 0 : i32
    return %c0_i32, %c0_i32_0 : i32, i32
  }
  func.func @transform_3(%arg0: i32, %arg1: i32) -> (i32, i32) {
    %c0_i32 = arith.constant 0 : i32
    %c0_i32_0 = arith.constant 0 : i32
    %c0_i32_1 = arith.constant 0 : i32
    return %c0_i32, %c0_i32_0 : i32, i32
  }
  func.func @transform_4(%arg0: i32, %arg1: i32) -> (i32, i32) {
    %c0_i32 = arith.constant 0 : i32
    %c0_i32_0 = arith.constant 0 : i32
    %c0_i32_1 = arith.constant 0 : i32
    return %c0_i32, %c0_i32_0 : i32, i32
  }
  func.func @transform_5(%arg0: i32, %arg1: i32) -> (i32, i32) {
    %c0_i32 = arith.constant 0 : i32
    %c0_i32_0 = arith.constant 0 : i32
    %c0_i32_1 = arith.constant 0 : i32
    return %c0_i32, %c0_i32_0 : i32, i32
  }
  func.func @transform_6(%arg0: i32, %arg1: i32) -> (i32, i32) {
    %c0_i32 = arith.constant 0 : i32
    %c0_i32_0 = arith.constant 0 : i32
    %c0_i32_1 = arith.constant 0 : i32
    return %c0_i32, %c0_i32_0 : i32, i32
  }
  func.func @transform_7(%arg0: i32, %arg1: i32) -> (i32, i32) {
    %c0_i32 = arith.constant 0 : i32
    %c0_i32_0 = arith.constant 0 : i32
    %c0_i32_1 = arith.constant 0 : i32
    return %c0_i32, %c0_i32_0 : i32, i32
  }
  func.func @transform_8(%arg0: i32, %arg1: i32) -> (i32, i32) {
    %c0_i32 = arith.constant 0 : i32
    %c0_i32_0 = arith.constant 0 : i32
    %c0_i32_1 = arith.constant 0 : i32
    return %c0_i32, %c0_i32_0 : i32, i32
  }
  func.func @transform_9(%arg0: i32, %arg1: i32) -> (i32, i32) {
    %c0_i32 = arith.constant 0 : i32
    %c0_i32_0 = arith.constant 0 : i32
    %c0_i32_1 = arith.constant 0 : i32
    return %c0_i32, %c0_i32_0 : i32, i32
  }
  func.func @transform_10(%arg0: i32, %arg1: i32) -> (i32, i32) {
    %c0_i32 = arith.constant 0 : i32
    %c0_i32_0 = arith.constant 0 : i32
    %c0_i32_1 = arith.constant 0 : i32
    return %c0_i32, %c0_i32_0 : i32, i32
  }
  func.func @transform_11(%arg0: i32, %arg1: i32) -> (i32, i32) {
    %c0_i32 = arith.constant 0 : i32
    %c0_i32_0 = arith.constant 0 : i32
    %c0_i32_1 = arith.constant 0 : i32
    return %c0_i32, %c0_i32_0 : i32, i32
  }
  func.func @transform_12(%arg0: i32, %arg1: i32) -> (i32, i32) {
    %c0_i32 = arith.constant 0 : i32
    %c0_i32_0 = arith.constant 0 : i32
    %c0_i32_1 = arith.constant 0 : i32
    return %c0_i32, %c0_i32_0 : i32, i32
  }
  func.func @transform_13(%arg0: i32, %arg1: i32) -> (i32, i32) {
    %c0_i32 = arith.constant 0 : i32
    %c0_i32_0 = arith.constant 0 : i32
    %c0_i32_1 = arith.constant 0 : i32
    return %c0_i32, %c0_i32_0 : i32, i32
  }
  func.func @transform_14(%arg0: i32, %arg1: i32) -> (i32, i32) {
    %c0_i32 = arith.constant 0 : i32
    %c0_i32_0 = arith.constant 0 : i32
    %c0_i32_1 = arith.constant 0 : i32
    return %c0_i32, %c0_i32_0 : i32, i32
  }
  func.func @transform_15(%arg0: i32, %arg1: i32) -> (i32, i32, i32) {
    %c0_i32 = arith.constant 0 : i32
    %c0_i32_0 = arith.constant 0 : i32
    return %arg0, %arg1, %c0_i32 : i32, i32, i32
  }
}

</mosaic_0001>

<bundles_post_ra>
// kernel: tpu_custom_call.1
= control target key start
LH: loop header
LB: loop body
LE: loop exit
PB: predicated region body
PF: predicated region fallthrough
CT: control target
= control target key end

     0   :  { %s3045_s0 = inlined_call_operand.vmem [shape: f32[2,16,32], index: 0, kind: input, shape index: {}]   ;;  %s3046_s1 = inlined_call_operand.vmem [shape: f32[32,32], index: 1, kind: input, shape index: {}]   ;;  %s3047_s2 = inlined_call_operand.vmem [shape: f32[1,32], index: 2, kind: input, shape index: {}]   ;;  %s3048_s3 = inlined_call_operand.vmem [shape: f32[32,32], index: 3, kind: input, shape index: {}]   ;;  %s3049_s4 = inlined_call_operand.vmem [shape: f32[1,32], index: 4, kind: input, shape index: {}]   ;;  %s3050_s5 = inlined_call_operand.hbm [shape: f32[32,32], index: 5, kind: input, shape index: {}]   ;;  %s3051_s6 = inlined_call_operand.vmem [shape: f32[1,32], index: 6, kind: input, shape index: {}]   ;;  %s3052_s7 = inlined_call_operand.hbm [shape: f32[32,32], index: 7, kind: input, shape index: {}]   ;;  %s3053_s8 = inlined_call_operand.vmem [shape: f32[1,32], index: 8, kind: input, shape index: {}]   ;;  %s3054_s9 = inlined_call_operand.hbm [shape: f32[32,64], index: 9, kind: input, shape index: {}]   ;;  %s3055_s10 = inlined_call_operand.vmem [shape: f32[1,64], index: 10, kind: input, shape index: {}]   ;;  %s3056_s11 = inlined_call_operand.vmem [shape: f32[64,32], index: 11, kind: input, shape index: {}]   ;;  %s3057_s12 = inlined_call_operand.vmem [shape: f32[1,32], index: 12, kind: input, shape index: {}]   ;;  %s3058_s13 = inlined_call_operand.vmem [shape: f32[1,32], index: 13, kind: input, shape index: {}]   ;;  %s3059_s14 = inlined_call_operand.vmem [shape: f32[1,32], index: 14, kind: input, shape index: {}]   ;;  %s3060_s15 = inlined_call_operand.hbm [shape: f32[2,16,32], index: 15, kind: output, shape index: {}]  }
   0x1   :  { %3072 = sst [smem:[#allocation23_spill]] %s3045_s0 }
   0x2   :  { %3073 = sst [smem:[#allocation24_spill]] %s3046_s1 }
   0x3   :  { %3074 = sst [smem:[#allocation25_spill]] %s3056_s11 }
   0x4   :  { %3075 = sst [smem:[#allocation26_spill]] %s3060_s15 }
   0x5   :  { %20 = vsyncpa [#allocation6], 0 }
   0x6   :  { %21 = vsyncpa [#allocation9], 0 }
   0x7   :  { %22 = vsyncpa [#allocation7], 0 }
   0x8   :  { %24 = vsyncpa [#allocation7 + $0x1], 0  ;;  %s2612_s18 = smov 0   ;;  %s2614_s19 = smov 0  }
   0x9   :  { %s2616_s20 = smov 0   ;;  %s2618_s21 = smov 0  }
   0xa   :  { %s2620_s22 = smov 0   ;;  %s2622_s23 = smov 0  }
   0xb   :  { %s2624_s24 = smov 0   ;;  %s2626_s25 = smov 0  }
   0xc LB: > { %3076 = sst [smem:[#allocation15_spill]] %s2488_s18  ;;  %s1962_s26 = sadd.s32 4294967295, %s2516_s25   ;;  %s2516_s25 = sphi %s2626_s25, %s30_s25   ;;  %s2512_s24 = sphi %s2624_s24, %s3103_s24   ;;  %s2508_s23 = sphi %s2622_s23, %s3106_s23   ;;  %s2504_s22 = sphi %s2620_s22, %s3101_s22   ;;  %s2500_s21 = sphi %s2618_s21, %s3100_s21   ;;  %s2496_s20 = sphi %s2616_s20, %s3099_s20   ;;  %s2492_s19 = sphi %s2614_s19, %s3105_s19   ;;  %s2488_s18 = sphi %s2612_s18, %s3104_s18  }
   0xd   : > { %3077 = sst [smem:[#allocation16_spill]] %s2496_s20  ;;  %s1963_s27 = sadd.s32 4294967294, %s2516_s25  }
   0xe   : > { %3078 = sst [smem:[#allocation17_spill]] %s2508_s23  ;;  %s39_s28 = sadd.s32 1, %s2508_s23 }
   0xf   : > { %3079 = sst [smem:[#allocation18_spill]] %s2512_s24  ;;  %s42_s29 = sadd.s32 1, %s2512_s24 }
  0x10   : > { %p40_p0 = scmp.ge.s32.totalorder %s39_s28, 2  ;;  %s371_s30 = sadd.s32 1, %s2496_s20 }
  0x11   : > { %p381_p1 = scmp.ne.s32.totalorder %s2496_s20, %s2492_s19  ;;  %p382_p2 = scmp.eq.s32.totalorder %s1962_s26, 3 }
  0x12   : > { %s3108_s28 = smov (%p40_p0, %s39_s28), 0  ;;  %s3110_s29 = smov (!%p40_p0, %s42_s29), %s2512_s24 }
  0x13   : > { %3080 = sst [smem:[#allocation19_spill]] %s3108_s28  ;;  %s367_s16 = ssub.s32 %s2508_s23, %s3108_s28 }
  0x14   : > { %p2664_p3 = por %p382_p2, %p381_p1  ;;  %p44_p4 = scmp.ge.s32.totalorder %s3110_s29, 2 }
  0x15   : > { %p387_p5 = scmp.ne.s32.totalorder %s2492_s19, %s2488_s18  ;;  %p388_p6 = scmp.eq.s32.totalorder %s1963_s27, 3 }
  0x16   : > { %p1964_p7 = scmp.ge.s32.totalorder %s2516_s25, 1  ;;  %s3112_s29 = smov (%p44_p4, %s3110_s29), 0 }
  0x17   : > { %3082 = sst [smem:[#allocation20_spill]] %s3112_s29  ;;  %p2673_p8 = por %p388_p6, %p387_p5 }
  0x18   : > { %p395_p9 = scmp.lt.s32.totalorder %s2516_s25, 5  ;;  %s366_s11 = ssub.s32 %s2512_s24, %s3112_s29 }
  0x19   : > { %s3083_s15 = scalar_select %p2673_p8, 1, 0 }
  0x1a   : > { %s368_s1 = sor.u32 %s367_s16, %s366_s11  ;;  %p2680_p10 = pnand %p1964_p7, %p395_p9 }
  0x1b   : > { %3084 = sst [smem:[#allocation21_spill]] %s3083_s15  ;;  %p369_p11 = scmp.eq.s32.totalorder %s368_s1, 0 }
  0x1c   : > { %p2684_p12 = scmp.eq.s32.totalorder %s1962_s26, 0  ;;  %p2220_p13 = pneg %p2680_p10 }
  0x1d   : > { %s2691_s27 = scalar_select %p369_p11, %s2496_s20, %s371_s30  }
  0x1e   : > { %p2695_p0 = pnand %p2684_p12, %p2220_p13  ;;  %s2518_s11 = smov [#allocation8]  }
  0x1f   : > { %3087 = sst [smem:[#allocation22_spill]] %s2691_s27  ;;  %s435_s16 = sshll.u32 %s2518_s11, 4  ;;  %s436_s16 = int_to_ptr.vmem [resolvable:$true] %s435_s16 }
  0x20   : > { %p2340_p1 = pneg %p2695_p0  ;;  %s2349_s1 = scalar_lea.vmem %s436_s16, 512 }
  0x21   : > { %p2350_p2 = scmp.ne.s32.totalorder %s436_s16, %s2349_s1  ;;  %p2357_p6 = scmp.lt.s32.totalorder %s436_s16, %s436_s16 }
  0x22   : > { %p2358_p7 = scmp.lt.s32.totalorder %s2349_s1, %s2349_s1 }
  0x23   : > { %p2352_p4 = pnand %p2350_p2, %p2340_p1 }
  0x24   : > { %p2359_p9 = por %p2358_p7, %p2357_p6 }
  0x25   : > { %p2353_p5 = pneg %p2352_p4 }
  0x27   : > { %p2360_p11 = pnand %p2359_p9, %p2353_p5 }
  0x29   : > { %2363 = shalt.err (!%p2360_p11)
}
  0x2a   : > { %s2519_s26 = smov 128   ;;  %s2520_s30 = smov 8  }
  0x2b   : > { %2226 = dma.hbm_to_vmem [thread:$0]  (!%p2695_p0), %s3052_s7, 512, %s436_s16, [#allocation9], %s2519_s26, %s2519_s26, %s2520_s30  }
  0x2c   : > { %s2521_s24 = smov [#allocation5]   ;;  %s2522_s20 = smov [#allocation10]  }
  0x2d   : > { %s419_s27 = sshll.u32 %s2521_s24, 4  ;;  %s451_s18 = sshll.u32 %s2522_s20, 4  ;;  %s420_s27 = int_to_ptr.vmem [resolvable:$true] %s419_s27  ;;  %s452_s18 = int_to_ptr.vmem [resolvable:$true] %s451_s18 }
  0x2e   : > { %s2375_s1 = scalar_lea.vmem %s420_s27, 512  ;;  %p2383_p5 = scmp.lt.s32.totalorder %s420_s27, %s420_s27 }
  0x2f   : > { %p2376_p13 = scmp.ne.s32.totalorder %s420_s27, %s2375_s1  ;;  %p2384_p6 = scmp.lt.s32.totalorder %s2375_s1, %s2375_s1 }
  0x31   : > { %p2378_p2 = pnand %p2376_p13, %p2340_p1  ;;  %p2385_p7 = por %p2384_p6, %p2383_p5 }
  0x33   : > { %p2379_p4 = pneg %p2378_p2 }
  0x35   : > { %p2386_p9 = pnand %p2385_p7, %p2379_p4 }
  0x37   : > { %2389 = shalt.err (!%p2386_p9)
}
  0x38   : > { %2223 = dma.hbm_to_vmem [thread:$0]  (!%p2695_p0), %s3050_s5, 512, %s420_s27, [#allocation6], %s2519_s26, %s2519_s26, %s2520_s30  }
  0x39   : > { %s2401_s29 = scalar_lea.vmem %s452_s18, 512  ;;  %p2409_p8 = scmp.lt.s32.totalorder %s452_s18, %s452_s18 }
  0x3a   : > { %p2402_p11 = scmp.ne.s32.totalorder %s452_s18, %s2401_s29  ;;  %p2410_p5 = scmp.lt.s32.totalorder %s2401_s29, %s2401_s29 }
  0x3c   : > { %p2404_p13 = pnand %p2402_p11, %p2340_p1  ;;  %p2411_p4 = por %p2410_p5, %p2409_p8 }
  0x3e   : > { %p2405_p2 = pneg %p2404_p13 }
  0x40   : > { %p2412_p6 = pnand %p2411_p4, %p2405_p2 }
  0x42   : > { %2415 = shalt.err (!%p2412_p6)
}
  0x43   : > { %2229 = dma.hbm_to_vmem [thread:$0]  (!%p2695_p0), %s3054_s9, 512, %s452_s18, [#allocation9], %s2519_s26, %s2519_s26, %s2520_s30  }
  0x44   : > { %490 = sbr.rel (%p2680_p10) target bundleno = 3222 (0xc96), region = 80 }
  0x49   : > { %2475 = dma.done.wait (%p2684_p12), [#allocation6], 512  }
  0x4a   : > { %2477 = vsyncadd (%p2684_p12), [#allocation6], 4294966784 }
  0x4b   : > { %2479 = dma.done.wait (%p2684_p12), [#allocation9], 1024  }
  0x4c   : > { %2481 = vsyncadd (%p2684_p12), [#allocation9], 4294966272  ;;  %s3071_s15 = sand.u32 1, %s2492_s19   ;;  %p546_p8 = scmp.lt.s32.totalorder %s2504_s22, 1  ;;  %v2759_v0 = vld [vmem:[%s3047_s2] ss:$0 sm:$0xff] }
  0x4d   : > { %s2748_s18 = sshll.u32 %s3071_s15, 3  ;;  %s3089_s0 = sld [smem:[#allocation23_spill]]  ;;  %v1977_v1 = vld [vmem:[%s3049_s4] ss:$0 sm:$0xff] }
  0x4e   : > { %s547_s28 = scalar_select %p546_p8, %s2504_s22, 1  ;;  %v1980_v2 = vld [vmem:[%s3051_s6] ss:$0 sm:$0xff] }
  0x4f   : > { %v2770_v3 = vld [vmem:[%s3053_s8] ss:$0 sm:$0xff]  ;;  %s545_s15 = scalar_lea.vmem [#allocation11], %s2748_s18  ;;  %p1976_p10 = scmp.ne.s32.totalorder %s2500_s21, 0 }
  0x50   : > { %s2015_s27 = sshll.u32 %s547_s28, 4  ;;  %v2775_v4 = vld [vmem:[%s3055_s10] ss:$0 sm:$0xff] }
  0x51   : > { %v2780_v5 = vld [vmem:[%s3057_s12] ss:$0 sm:$0xff]  ;;  %562 = sbr.rel (%p1976_p10) target bundleno = 294 (0x126), region = 96 }
  0x52   : > { %v2785_v6 = vld [vmem:[%s3058_s13] ss:$0 sm:$0xff] }
  0x53   : > { %s2754_s1 = scalar_lea.vmem %s3089_s0, %s2015_s27  ;;  %v2790_v7 = vld [vmem:[%s3059_s14] ss:$0 sm:$0xff] }
  0x56   : > { %v568_v8 = vld [vmem:[%s3048_s3 + $0x18] sm:$0xff]  ;;  %v662_v9 = vld [vmem:[#allocation5 + $0x18] sm:$0xff]  ;;  %v567_v10 = vld [vmem:[%s3048_s3 + $0x10] sm:$0xff]  ;;  %vm575_vm0 = vcmask 261120  }
  0x57   : > { %2076 = vmatprep.subr.mxu0 %v568_v8  ;;  %2087 = vmatprep.subr.mxu1 %v662_v9  ;;  %v661_v11 = vld [vmem:[#allocation5 + $0x10] sm:$0xff]  ;;  %v566_v12 = vld [vmem:[%s3048_s3 + $0x8] sm:$0xff]  ;;  %v660_v13 = vld [vmem:[#allocation5 + $0x8] sm:$0xff] }
  0x58   : > { %2077 = vmatpush3.msra.mxu0 %v568_v8  ;;  %2088 = vmatpush3.msra.mxu1 %v662_v9  ;;  %v565_v14 = vld [vmem:[%s3048_s3] sm:$0xff]  ;;  %v659_v15 = vld [vmem:[#allocation5] sm:$0xff] }
  0x59   : > { %2078 = vmatprep.subr.mxu0 %v567_v10  ;;  %2089 = vmatprep.subr.mxu1 %v661_v11  ;;  %v563_v16 = vld [vmem:[%s2754_s1] sm:$0xff]  ;;  %v564_v17 = vld [vmem:[%s2754_s1 + $0x8] sm:$0xff] }
  0x5a   : > { %2079 = vmatpush3.msra.mxu0 %v567_v10  ;;  %2090 = vmatpush3.msra.mxu1 %v661_v11 }
  0x5b   : > { %2080 = vmatprep.subr.mxu0 %v566_v12  ;;  %2091 = vmatprep.subr.mxu1 %v660_v13 }
  0x5c   : > { %2081 = vmatpush3.msra.mxu0 %v566_v12  ;;  %2092 = vmatpush3.msra.mxu1 %v660_v13 }
  0x5d   : > { %2082 = vmatprep.subr.mxu0 %v565_v14  ;;  %2093 = vmatprep.subr.mxu1 %v659_v15 }
  0x5e   : > { %2083 = vmatpush3.msra.mxu0 %v565_v14  ;;  %2084 = vmatprep.mubr.msk.f32.mxu0 %vm575_vm0, %v563_v16 }
  0x5f   : > { %2094 = vmatpush3.msra.mxu1 %v659_v15  ;;  %2095 = vmatprep.mubr.msk.f32.mxu1 %vm575_vm0, %v563_v16 }
  0x60   : > { %2085 = vmatmul.mubr.msk.f32.vlgmr.msra.gmra.mxu0 %vm575_vm0, %v564_v17  ;;  %2096 = vmatmul.mubr.msk.f32.vlgmr.msra.gmra.mxu1 %vm575_vm0, %v564_v17 }
 0x120   : > { %v2086_v18 = vpop.f32.mrf.mxu0  ;;  %v2097_v19 = vpop.f32.mrf.mxu1 }
 0x121   : > { %v654_v20 = vadd.f32 %v2086_v18, %v1977_v1  ;;  %v741_v21 = vadd.f32 %v2097_v19, %v1980_v2 }
 0x122   : > { %v648_v22 = vpop.f32.mrf.mxu0  ;;  %v735_v23 = vpop.f32.mrf.mxu1 }
 0x123   : > { %658 = vst.msk [vmem:[#allocation2 + $0x8] sm:$0xff] %vm575_vm0, %v654_v20  ;;  %745 = vst.msk [vmem:[#allocation3 + $0x8] sm:$0xff] %vm575_vm0, %v741_v21  ;;  %v649_v24 = vadd.f32 %v1977_v1, %v648_v22  ;;  %v736_v25 = vadd.f32 %v1980_v2, %v735_v23 }
 0x125   : > { %657 = vst.msk [vmem:[#allocation2] sm:$0xff] %vm575_vm0, %v649_v24  ;;  %744 = vst.msk [vmem:[#allocation3] sm:$0xff] %vm575_vm0, %v736_v25 }
 0x126 PF: > { %s3090_s11 = sld [smem:[#allocation24_spill]]  ;;  %s1983_s28 = sshll.u32 %s2500_s21, 3  ;;  %v2523_v27 = vmov 0.0   ;;  %vm2524_vm1 = vmmov 0   ;;  %vm759_vm2 = vcmask 261120   ;;  %vm837_vm3 = vcmask 64512  }
 0x127   : > { %2098 = vmatprep.subr.mxu1 %v2523_v27  ;;  %2106 = vmatprep.mubr.msk.f32.mxu1 %vm2524_vm1, %v2523_v27  ;;  %s2525_s30 = smov 120   ;;  %s747_s20 = scalar_lea.vmem %s2754_s1, %s1983_s28  ;;  %vm917_vm4 = vcmask 130048   ;;  %vm1181_vm5 = vcmask 130112   ;;  %vm1359_vm6 = vcmask 195712   ;;  %vm1537_vm7 = vcmask 261312  }
 0x128   : > { %2116 = vmatprep.subr.mxu0 %v2523_v27  ;;  %2120 = vmatprep.mubr.msk.f32.mxu0 %vm2524_vm1, %v2523_v27  ;;  %v2841_v33 = vld [vmem:[%s747_s20] sm:$0xff]  ;;  %s2526_s1 = smov 112   ;;  %s2527_s28 = smov 104   ;;  %vm1750_vm8 = vcmask 523264  }
 0x129   : > { %s2528_s27 = smov 8   ;;  %s2529_s26 = smov 16  }
 0x12a   : > { %v834_v29 = vld [vmem:[#allocation2 + $0x8] sm:$0xff]  ;;  %v2865_v39 = vld [vmem:[#allocation3 + $0x8] sm:$0xff]  ;;  %s3091_s20 = sld [smem:[#allocation25_spill]] }
 0x12b   : > { %1007 = vrot.lane.b32.xlu0 %v834_v29, %s2525_s30  ;;  %2117 = vmatpush3.msra.mxu0 %v2865_v39 }
 0x12c   : > { %v752_v26 = vld [vmem:[%s3090_s11 + $0x18] sm:$0xff]  ;;  %v751_v28 = vld [vmem:[%s3090_s11 + $0x10] sm:$0xff]  ;;  %v750_v30 = vld [vmem:[%s3090_s11 + $0x8] sm:$0xff]  ;;  %2118 = vmatprep.subr.mxu0 %v2523_v27 }
 0x12d   : > { %2099 = vmatpush3.msra.mxu1 %v752_v26  ;;  %v2832_v31 = vld [vmem:[#allocation2] sm:$0xff]  ;;  %v2868_v40 = vld [vmem:[#allocation3] sm:$0xff] }
 0x12e   : > { %2100 = vmatprep.subr.mxu1 %v2523_v27  ;;  %v749_v32 = vld [vmem:[%s3090_s11] sm:$0xff]  ;;  %2119 = vmatpush3.msra.mxu0 %v2868_v40 }
 0x12f   : > { %2101 = vmatpush3.msra.mxu1 %v751_v28  ;;  %1005 = vrot.lane.b32.xlu0 %v2832_v31, %s2525_s30 }
 0x130   : > { %2102 = vmatprep.subr.mxu1 %v2523_v27  ;;  %2130 = vmatprep.subr.mxu0 %v2523_v27  ;;  %s3092_s29 = smov %s3091_s20 }
 0x131   : > { %2103 = vmatpush3.msra.mxu1 %v750_v30 }
 0x132   : > { %2104 = vmatprep.subr.mxu1 %v2523_v27 }
 0x133   : > { %2105 = vmatpush3.msra.mxu1 %v749_v32 }
 0x134   : > { %2107 = vmatmul.mubr.msk.f32.vlgmr.msra.gmra.mxu1 %vm759_vm2, %v2841_v33  ;;  %2109 = vmatprep.subr.mxu1 %v2523_v27 }
 0x135   : > { %2110 = vmatpush3.xpose.msk.msra.mxu1 %vm837_vm3, %v834_v29  ;;  %2113 = vmatprep.mubr.msk.f32.mxu1 %vm2524_vm1, %v2523_v27 }
 0x136   : > { %2111 = vmatprep.subr.mxu1 %v2523_v27 }
 0x139   : > { %2112 = vmatpush3.xpose.msk.msra.mxu1 %vm837_vm3, %v2832_v31 }
 0x13a   : > { %2123 = vmatprep.subr.mxu1 %v2523_v27 }
 0x19d   : > { %v1008_v34 = vpop.permute.xlu0 %1007 }
 0x1a1   : > { %v1006_v38 = vpop.permute.xlu0 %1005 }
 0x1f4   : > { %v829_v35 = vpop.f32.mrf.mxu1 }
 0x1f5   : > { %v830_v36 = vadd.f32 %v2759_v0, %v829_v35 }
 0x1f6   : > { %v2108_v37 = vpop.f32.mrf.mxu1 }
 0x1f7   : > { %1003 = vrot.lane.b32.xlu1 %v830_v36, %s2525_s30  ;;  %2114 = vmatmul.mubr.msk.f32.vlgmr.msra.gmra.mxu1 %vm837_vm3, %v830_v36 }
 0x1f8   : > { %2124 = vmatpush3.xpose.msk.msra.mxu1 %vm837_vm3, %v1008_v34  ;;  %2127 = vmatprep.mubr.msk.f32.mxu1 %vm2524_vm1, %v2523_v27 }
 0x1f9   : > { %2125 = vmatprep.subr.mxu1 %v2523_v27 }
 0x1fc   : > { %2126 = vmatpush3.xpose.msk.msra.mxu1 %vm837_vm3, %v1006_v38 }
 0x1fd   : > { %2144 = vmatprep.subr.mxu1 %v2523_v27 }
 0x269   : > { %v1004_v41 = vpop.permute.xlu1 %1003 }
 0x26a   : > { %2128 = vmatmul.mubr.msk.f32.vlgmr.msra.gmra.mxu1 %vm837_vm3, %v1004_v41 }
 0x26b   : > { %2148 = vmatprep.mubr.msk.f32.mxu1 %vm2524_vm1, %v2523_v27 }
 0x2b7   : > { %v913_v42 = vpop.f32.mrf.mxu1 }
 0x2b8   : > { %v918_v43 = vsel %vm917_vm4, %v913_v42, -inf }
 0x2b9   : > { %919 = vmax.xlane.f32.xlu1 %v918_v43  ;;  %v2115_v44 = vpop.f32.mrf.mxu1 }
 0x2ca   : > { %1096 = vrot.lane.b32.xlu1 %v2868_v40, %s2525_s30 }
 0x2ce   : > { %1187 = vrot.lane.b32.xlu1 %v834_v29, %s2526_s1 }
 0x2d2   : > { %1183 = vrot.lane.b32.xlu1 %v830_v36, %s2526_s1 }
 0x2d6   : > { %1276 = vrot.lane.b32.xlu1 %v2865_v39, %s2526_s1 }
 0x2da   : > { %1274 = vrot.lane.b32.xlu1 %v2868_v40, %s2526_s1 }
 0x2de   : > { %1365 = vrot.lane.b32.xlu1 %v834_v29, %s2527_s28 }
 0x2e2   : > { %1363 = vrot.lane.b32.xlu1 %v2832_v31, %s2527_s28 }
 0x2e6   : > { %1361 = vrot.lane.b32.xlu1 %v830_v36, %s2527_s28 }
 0x32a   : > { %v1081_v45 = vpop.f32.mrf.mxu1 }
 0x32b   : > { %v1085_v46 = vsel %vm917_vm4, %v1081_v45, -inf }
 0x32c   : > { %1086 = vmax.xlane.f32.xlu0 %v1085_v46  ;;  %v2129_v47 = vpop.f32.mrf.mxu1 }
 0x32d   : > { %v1543_v47 = vld [vmem:[#allocation8 + $0x18] sm:$0xff] }
 0x342   : > { %v920_v48 = vpop.xlane.xlu1 %919  ;;  %1098 = vrot.lane.b32.xlu0 %v2865_v39, %s2525_s30  ;;  %s2530_s30 = smov 24  }
 0x343   : > { %v921_v49 = vsub.f32 %v913_v42, %v920_v48  ;;  %v1542_v48 = vld [vmem:[#allocation8 + $0x10] sm:$0xff] }
 0x345   : > { %v922_v50 = vmul.f32 1.442695, %v921_v49  ;;  %v1541_v49 = vld [vmem:[#allocation8 + $0x8] sm:$0xff] }
 0x346   : > { %v1097_v51 = vpop.permute.xlu1 %1096  ;;  %1185 = vrot.lane.b32.xlu0 %v2832_v31, %s2526_s1 }
 0x347   : > { %2318 = vpow2.f32 %v922_v50  ;;  %v1540_v50 = vld [vmem:[#allocation8] sm:$0xff] }
 0x34a   : > { %v1188_v52 = vpop.permute.xlu1 %1187 }
 0x34e   : > { %v1184_v53 = vpop.permute.xlu1 %1183 }
 0x352   : > { %v1277_v54 = vpop.permute.xlu1 %1276 }
 0x353   : > { %2145 = vmatpush3.msra.mxu1 %v1277_v54 }
 0x354   : > { %v2889_v55 = vpop.eup %2318  ;;  %2146 = vmatprep.subr.mxu1 %v2523_v27 }
 0x355   : > { %2121 = vmatmul.mubr.msk.f32.vlgmr.msra.gmra.mxu0 %vm917_vm4, %v2889_v55  ;;  %v924_v35 = vsel %vm917_vm4, %v2889_v55, 0.0 }
 0x356   : > { %v1275_v56 = vpop.permute.xlu1 %1274  ;;  %2134 = vmatprep.mubr.msk.f32.mxu0 %vm2524_vm1, %v2523_v27 }
 0x357   : > { %2147 = vmatpush3.msra.mxu1 %v1275_v56 }
 0x358   : > { %2151 = vmatprep.subr.mxu1 %v2523_v27 }
 0x35a   : > { %v1366_v16 = vpop.permute.xlu1 %1365 }
 0x35e   : > { %v1364_v19 = vpop.permute.xlu1 %1363 }
 0x362   : > { %v1362_v20 = vpop.permute.xlu1 %1361 }
 0x3b5   : > { %v1087_v57 = vpop.xlane.xlu0 %1086 }
 0x3b6   : > { %v1088_v58 = vsub.f32 %v1081_v45, %v1087_v57 }
 0x3b8   : > { %v1089_v59 = vmul.f32 1.442695, %v1088_v58 }
 0x3b9   : > { %v1099_v60 = vpop.permute.xlu0 %1098 }
 0x3ba   : > { %2320 = vpow2.f32 %v1089_v59  ;;  %2131 = vmatpush3.msra.mxu0 %v1099_v60 }
 0x3bb   : > { %2132 = vmatprep.subr.mxu0 %v2523_v27 }
 0x3bc   : > { %2133 = vmatpush3.msra.mxu0 %v1097_v51 }
 0x3bd   : > { %2137 = vmatprep.subr.mxu0 %v2523_v27  ;;  %v1186_v62 = vpop.permute.xlu0 %1185 }
 0x3c7   : > { %v2321_v61 = vpop.eup %2320 }
 0x3c8   : > { %2135 = vmatmul.mubr.msk.f32.vlgmr.msra.gmra.mxu0 %vm917_vm4, %v2321_v61  ;;  %v1091_v26 = vsel %vm917_vm4, %v2321_v61, 0.0 }
 0x3c9   : > { %2138 = vmatpush3.xpose.msk.msra.mxu0 %vm837_vm3, %v1188_v52  ;;  %2141 = vmatprep.mubr.msk.f32.mxu0 %vm2524_vm1, %v2523_v27 }
 0x3ca   : > { %2139 = vmatprep.subr.mxu0 %v2523_v27 }
 0x3cd   : > { %2140 = vmatpush3.xpose.msk.msra.mxu0 %vm837_vm3, %v1186_v62 }
 0x3ce   : > { %2158 = vmatprep.subr.mxu0 %v2523_v27 }
 0x3d0   : > { %2142 = vmatmul.mubr.msk.f32.vlgmr.msra.gmra.mxu0 %vm837_vm3, %v1184_v53 }
 0x3d1   : > { %2162 = vmatprep.mubr.msk.f32.mxu0 %vm2524_vm1, %v2523_v27 }
 0x415   : > { %v2909_v63 = vpop.f32.mrf.mxu0 }
 0x417   : > { %v2122_v0 = vpop.f32.mrf.mxu0 }
 0x488   : > { %v1171_v1 = vpop.f32.mrf.mxu0 }
 0x48a   : > { %v2136_v2 = vpop.f32.mrf.mxu0 }
 0x490   : > { %v1261_v8 = vpop.f32.mrf.mxu0 }
 0x491   : > { %v1265_v9 = vsel %vm917_vm4, %v1261_v8, -inf }
 0x492   : > { %1266 = vmax.xlane.f32.xlu0 %v1265_v9  ;;  %v2143_v10 = vpop.f32.mrf.mxu0  ;;  %v1654_v9 = vld [vmem:[#allocation10 + $0x10] sm:$0xff] }
 0x493   : > { %v1653_v10 = vld [vmem:[#allocation10 + $0x8] sm:$0xff] }
 0x4a8   : > { %1454 = vrot.lane.b32.xlu0 %v2865_v39, %s2527_s28 }
 0x4ac   : > { %1452 = vrot.lane.b32.xlu0 %v2868_v40, %s2527_s28  ;;  %s3093_s28 = sld [smem:[#allocation26_spill]] }
 0x51b   : > { %v1267_v11 = vpop.xlane.xlu0 %1266 }
 0x51c   : > { %v1268_v12 = vsub.f32 %v1261_v8, %v1267_v11  ;;  %v1655_v8 = vld [vmem:[#allocation10 + $0x18] sm:$0xff]  ;;  %v1742_v11 = vld [vmem:[%s3092_s29 + $0x30] sm:$0xff] }
 0x51e   : > { %v1269_v13 = vmul.f32 1.442695, %v1268_v12  ;;  %v1741_v12 = vld [vmem:[%s3092_s29 + $0x28] sm:$0xff] }
 0x51f   : > { %v1455_v14 = vpop.permute.xlu0 %1454 }
 0x520   : > { %2322 = vpow2.f32 %v1269_v13  ;;  %2159 = vmatpush3.msra.mxu0 %v1455_v14  ;;  %v1740_v13 = vld [vmem:[%s3092_s29 + $0x20] sm:$0xff]  ;;  %v1739_v14 = vld [vmem:[%s3092_s29 + $0x18] sm:$0xff] }
 0x521   : > { %2160 = vmatprep.subr.mxu0 %v2523_v27 }
 0x523   : > { %v1453_v15 = vpop.permute.xlu0 %1452 }
 0x524   : > { %2161 = vmatpush3.msra.mxu0 %v1453_v15 }
 0x525   : > { %2165 = vmatprep.subr.mxu0 %v2523_v27 }
 0x52d   : > { %v2323_v17 = vpop.eup %2322 }
 0x52e   : > { %2149 = vmatmul.mubr.msk.f32.vlgmr.msra.gmra.mxu1 %vm917_vm4, %v2323_v17  ;;  %v1271_v18 = vsel %vm917_vm4, %v2323_v17, 0.0 }
 0x52f   : > { %2152 = vmatpush3.xpose.msk.msra.mxu1 %vm837_vm3, %v1366_v16  ;;  %1272 = vadd.xlane.f32.xlu0 %v1271_v18 }
 0x530   : > { %2153 = vmatprep.subr.mxu1 %v2523_v27  ;;  %2155 = vmatprep.mubr.msk.f32.mxu1 %vm2524_vm1, %v2523_v27 }
 0x533   : > { %2154 = vmatpush3.xpose.msk.msra.mxu1 %vm837_vm3, %v1364_v19 }
 0x534   : > { %2176 = vmatprep.subr.mxu1 %v2523_v27 }
 0x536   : > { %2156 = vmatmul.mubr.msk.f32.vlgmr.msra.gmra.mxu1 %vm837_vm3, %v1362_v20 }
 0x537   : > { %2184 = vmatprep.mubr.msk.f32.mxu1 %vm2524_vm1, %v2523_v27  ;;  %2177 = vmatpush3.msra.mxu1 %v1655_v8 }
 0x538   : > { %2178 = vmatprep.subr.mxu1 %v2523_v27 }
 0x539   : > { %2179 = vmatpush3.msra.mxu1 %v1654_v9 }
 0x53a   : > { %2180 = vmatprep.subr.mxu1 %v2523_v27 }
 0x53b   : > { %2181 = vmatpush3.msra.mxu1 %v1653_v10 }
 0x53c   : > { %2182 = vmatprep.subr.mxu1 %v2523_v27 }
 0x5b8   : > { %v1273_v36 = vpop.xlane.xlu0 %1272 }
 0x5ee   : > { %v1349_v21 = vpop.f32.mrf.mxu1 }
 0x5f0   : > { %v2150_v22 = vpop.f32.mrf.mxu1 }
 0x5f1   : > { %v1738_v22 = vld [vmem:[%s3092_s29 + $0x10] sm:$0xff] }
 0x5f6   : > { %v1439_v23 = vpop.f32.mrf.mxu1 }
 0x5f7   : > { %v1443_v24 = vsel %vm917_vm4, %v1439_v23, -inf }
 0x5f8   : > { %1444 = vmax.xlane.f32.xlu1 %v1443_v24  ;;  %v2157_v25 = vpop.f32.mrf.mxu1  ;;  %v1736_v24 = vld [vmem:[%s3092_s29] sm:$0xff] }
 0x5fc   : > { %1092 = vadd.xlane.f32.xlu1 %v1091_v26 }
 0x681   : > { %v1445_v28 = vpop.xlane.xlu1 %1444 }
 0x682   : > { %v1446_v29 = vsub.f32 %v1439_v23, %v1445_v28  ;;  %v1737_v23 = vld [vmem:[%s3092_s29 + $0x8] sm:$0xff] }
 0x684   : > { %v1447_v30 = vmul.f32 1.442695, %v1446_v29 }
 0x685   : > { %v1093_v34 = vpop.xlane.xlu1 %1092 }
 0x686   : > { %2324 = vpow2.f32 %v1447_v30 }
 0x687   : > { %2326 = vrcp.f32 %v1093_v34 }
 0x688   : > { %2328 = vrcp.f32 %v1273_v36 }
 0x693   : > { %v2325_v31 = vpop.eup %2324 }
 0x694   : > { %2163 = vmatmul.mubr.msk.f32.vlgmr.msra.gmra.mxu0 %vm917_vm4, %v2325_v31  ;;  %v1449_v32 = vsel %vm917_vm4, %v2325_v31, 0.0  ;;  %v2327_v37 = vpop.eup %2326 }
 0x695   : > { %1450 = vadd.xlane.f32.xlu1 %v1449_v32  ;;  %2173 = vmatprep.mubr.msk.f32.mxu0 %vm2524_vm1, %v2523_v27  ;;  %v1176_v38 = vmul.f32 %v2327_v37, %v1171_v1  ;;  %v2329_v39 = vpop.eup %2328 }
 0x696   : > { %v1354_v40 = vmul.f32 %v2329_v39, %v1349_v21  ;;  %2166 = vmatpush3.msra.mxu0 %v1543_v47 }
 0x697   : > { %2167 = vmatprep.subr.mxu0 %v2523_v27 }
 0x698   : > { %2168 = vmatpush3.msra.mxu0 %v1542_v48 }
 0x699   : > { %925 = vadd.xlane.f32.xlu1 %v924_v35  ;;  %2169 = vmatprep.subr.mxu0 %v2523_v27 }
 0x69a   : > { %2170 = vmatpush3.msra.mxu0 %v1541_v49 }
 0x69b   : > { %2171 = vmatprep.subr.mxu0 %v2523_v27 }
 0x69c   : > { %2172 = vmatpush3.msra.mxu0 %v1540_v50 }
 0x69d   : > { %2187 = vmatprep.subr.mxu0 %v2523_v27 }
 0x6aa   : > { %1178 = vrot.lane.b32.xlu1 %v1176_v38, %s2528_s27 }
 0x6ae   : > { %1356 = vrot.lane.b32.xlu1 %v1354_v40, %s2529_s26  ;;  %s3094_s26 = sand.u32 1, %s2492_s19  }
 0x71e   : > { %v1451_v41 = vpop.xlane.xlu1 %1450 }
 0x722   : > { %v926_v42 = vpop.xlane.xlu1 %925 }
 0x723   : > { %2330 = vrcp.f32 %v926_v42 }
 0x724   : > { %2332 = vrcp.f32 %v1451_v41 }
 0x726   : > { %v1179_v43 = vpop.permute.xlu1 %1178 }
 0x72a   : > { %v1357_v46 = vpop.permute.xlu1 %1356 }
 0x730   : > { %v2331_v44 = vpop.eup %2330 }
 0x731   : > { %v1001_v45 = vmul.f32 %v2331_v44, %v2909_v63  ;;  %v2333_v51 = vpop.eup %2332 }
 0x733   : > { %1002 = vst.msk [vmem:[#allocation4] sm:$0xff] %vm837_vm3, %v1001_v45 }
 0x734   : > { %1182 = vst.msk [vmem:[#allocation4] sm:$0xff] %vm1181_vm5, %v1179_v43 }
 0x735   : > { %1360 = vst.msk [vmem:[#allocation4] sm:$0xff] %vm1359_vm6, %v1357_v46 }
 0x754   : > { %v1527_v52 = vpop.f32.mrf.mxu0 }
 0x755   : > { %v1532_v53 = vmul.f32 %v2333_v51, %v1527_v52 }
 0x756   : > { %v2164_v54 = vpop.f32.mrf.mxu0 }
 0x757   : > { %1534 = vrot.lane.b32.xlu0 %v1532_v53, %s2530_s30  ;;  %s2011_s30 = sshll.u32 %s2504_s22, 1  ;;  %s1842_s22 = scalar_lea.sflag [#allocation7], %s3094_s26 }
 0x758   : > { %s1853_s24 = sadd.s32 %s2500_s21, %s2011_s30  ;;  %s2531_s30 = smov [#allocation11]  }
 0x759   : > { %s2012_s23 = sshll.u32 %s1853_s24, 7  ;;  %s2420_s24 = sshll.u32 %s2531_s30, 4  ;;  %s2421_s24 = int_to_ptr.vmem [resolvable:$false] %s2420_s24 }
 0x75a   : > { %s1855_s27 = scalar_lea.hbm %s3093_s28, %s2012_s23  ;;  %s2422_s0 = scalar_lea.vmem %s2421_s24, 256 }
 0x7c9   : > { %v1535_v55 = vpop.permute.xlu0 %1534 }
 0x7ca   : > { %1538 = vst.msk [vmem:[#allocation4] sm:$0xff] %vm1537_vm7, %v1535_v55 }
 0x7d1   : > { %v1539_v56 = vld [vmem:[#allocation4] sm:$0xff] }
 0x7d2   : > { %2174 = vmatmul.mubr.msk.f32.vlgmr.msra.gmra.mxu0 %vm759_vm2, %v1539_v56 }
 0x7d3   : > { %2203 = vmatprep.mubr.msk.f32.mxu0 %vm2524_vm1, %v2523_v27 }
 0x892   : > { %v1619_v57 = vpop.f32.mrf.mxu0 }
 0x893   : > { %v1620_v58 = vadd.f32 %v2770_v3, %v1619_v57  ;;  %v1652_v3 = vld [vmem:[#allocation10] sm:$0xff] }
 0x894   : > { %v2175_v59 = vpop.f32.mrf.mxu0  ;;  %2183 = vmatpush3.msra.mxu1 %v1652_v3 }
 0x895   : > { %v1623_v60 = vadd.f32 %v1620_v58, %v2841_v33  ;;  %v1743_v33 = vld [vmem:[%s3091_s20 + $0x38] sm:$0xff]  ;;  %s1857_s20 = sshll.u32 %s545_s15, 4  ;;  %s1858_s20 = int_to_ptr.vmem [resolvable:$true] %s1857_s20 }
 0x896   : > { %2188 = vmatpush3.msra.mxu0 %v1743_v33  ;;  %s2416_s21 = scalar_lea.vmem %s1858_s20, 128  ;;  %p2423_p7 = scmp.lt.s32.totalorder %s1858_s20, %s2421_s24 }
 0x897   : > { %v1624_v61 = vsel %vm759_vm2, %v1623_v60, 0.0  ;;  %2189 = vmatprep.subr.mxu0 %v2523_v27  ;;  %p2417_p12 = scmp.ne.s32.totalorder %s1858_s20, %s2416_s21  ;;  %p2424_p9 = scmp.lt.s32.totalorder %s2422_s0, %s2416_s21 }
 0x898   : > { %1625 = vadd.xlane.f32.xlu1 %v1624_v61  ;;  %2190 = vmatpush3.msra.mxu0 %v1742_v11 }
 0x899   : > { %2191 = vmatprep.subr.mxu0 %v2523_v27  ;;  %p2418_p0 = pnand %p2417_p12, %p2664_p3  ;;  %p2425_p11 = por %p2424_p9, %p2423_p7 }
 0x89a   : > { %2192 = vmatpush3.msra.mxu0 %v1741_v12 }
 0x89b   : > { %2193 = vmatprep.subr.mxu0 %v2523_v27  ;;  %p2419_p1 = pneg %p2418_p0 }
 0x89c   : > { %2194 = vmatpush3.msra.mxu0 %v1740_v13 }
 0x89d   : > { %2195 = vmatprep.subr.mxu0 %v2523_v27  ;;  %p2426_p13 = pnand %p2425_p11, %p2419_p1 }
 0x89e   : > { %2196 = vmatpush3.msra.mxu0 %v1739_v14 }
 0x89f   : > { %2197 = vmatprep.subr.mxu0 %v2523_v27 }
 0x8a0   : > { %2198 = vmatpush3.msra.mxu0 %v1738_v22 }
 0x8a1   : > { %2199 = vmatprep.subr.mxu0 %v2523_v27 }
 0x8a2   : > { %2200 = vmatpush3.msra.mxu0 %v1737_v23 }
 0x8a3   : > { %2201 = vmatprep.subr.mxu0 %v2523_v27 }
 0x8a4   : > { %2202 = vmatpush3.msra.mxu0 %v1736_v24 }
 0x921   : > { %v1626_v62 = vpop.xlane.xlu1 %1625 }
 0x922   : > { %v1628_v63 = vmul.f32 0.03125, %v1626_v62 }
 0x924   : > { %v1629_v0 = vsub.f32 %v1623_v60, %v1628_v63 }
 0x926   : > { %v1630_v1 = vmul.f32 %v1629_v0, %v1629_v0 }
 0x928   : > { %v1631_v2 = vsel %vm759_vm2, %v1630_v1, 0.0 }
 0x929   : > { %1632 = vadd.xlane.f32.xlu0 %v1631_v2 }
 0x9b2   : > { %v1633_v15 = vpop.xlane.xlu0 %1632 }
 0x9b3   : > { %v1634_v16 = vmul.f32 0.03125, %v1633_v15 }
 0x9b5   : > { %v1635_v17 = vadd.f32 1e-05, %v1634_v16 }
 0x9b7   : > { %2334 = vrsqrt.f32 %v1635_v17 }
 0x9c4   : > { %v2335_v18 = vpop.eup %2334 }
 0x9c5   : > { %v1637_v19 = vmul.f32 %v2335_v18, %v1629_v0 }
 0x9c7   : > { %v1644_v20 = vmul.f32 %v2785_v6, %v1637_v19 }
 0x9c9   : > { %v1651_v21 = vadd.f32 %v2790_v7, %v1644_v20 }
 0x9cb   : > { %2185 = vmatmul.mubr.msk.f32.vlgmr.msra.gmra.mxu1 %vm759_vm2, %v1651_v21 }
 0xa8b   : > { %v1731_v25 = vpop.f32.mrf.mxu1 }
 0xa8c   : > { %v1732_v26 = vadd.f32 %v2775_v4, %v1731_v25 }
 0xa8d   : > { %v2186_v28 = vpop.f32.mrf.mxu1 }
 0xa8e   : > { %v1735_v29 = vmax.f32 %v1732_v26, 0.0 }
 0xa90   : > { %2204 = vmatmul.mubr.msk.f32.vlgmr.msra.gmra.mxu0 %vm1750_vm8, %v1735_v29 }
 0xb50   : > { %v1820_v30 = vpop.f32.mrf.mxu0 }
 0xb51   : > { %v1821_v31 = vadd.f32 %v2780_v5, %v1820_v30 }
 0xb52   : > { %v2205_v32 = vpop.f32.mrf.mxu0 }
 0xb53   : > { %v1824_v34 = vadd.f32 %v1821_v31, %v1651_v21 }
 0xb55   : > { %v1825_v35 = vsel %vm759_vm2, %v1824_v34, 0.0 }
 0xb56   : > { %1826 = vadd.xlane.f32.xlu1 %v1825_v35 }
 0xbdf   : > { %v1827_v27 = vpop.xlane.xlu1 %1826 }
 0xbe0   : > { %v1828_v36 = vmul.f32 0.03125, %v1827_v27 }
 0xbe2   : > { %v1829_v37 = vsub.f32 %v1824_v34, %v1828_v36 }
 0xbe4   : > { %v1830_v38 = vmul.f32 %v1829_v37, %v1829_v37 }
 0xbe6   : > { %v1831_v4 = vsel %vm759_vm2, %v1830_v38, 0.0 }
 0xbe7   : > { %1832 = vadd.xlane.f32.xlu1 %v1831_v4 }
 0xc70   : > { %v1833_v39 = vpop.xlane.xlu1 %1832 }
 0xc71   : > { %v1834_v40 = vmul.f32 0.03125, %v1833_v39 }
 0xc73   : > { %v1835_v41 = vadd.f32 1e-05, %v1834_v40 }
 0xc75   : > { %2336 = vrsqrt.f32 %v1835_v41 }
 0xc82   : > { %v2337_v5 = vpop.eup %2336 }
 0xc83   : > { %v1837_v42 = vmul.f32 %v2337_v5, %v1829_v37 }
 0xc85   : > { %v1838_v43 = vmul.f32 %v2785_v6, %v1837_v42 }
 0xc87   : > { %v1839_v44 = vadd.f32 %v2790_v7, %v1838_v43 }
 0xc89   : > { %1840 = vst.msk [vmem:[%s545_s15] sm:$0xff] %vm759_vm2, %v1839_v44 }
 0xc8a   : > { %2429 = shalt.err (!%p2426_p13)
}
 0xc8b   : > { %s2430_s23 = scalar_lea.hbm %s1855_s27, 128  ;;  %s2434_s16 = scalar_lea.hbm %s3093_s28, 512 }
 0xc8c   : > { %p2431_p2 = scmp.ne.s32.totalorder %s1855_s27, %s2430_s23  ;;  %p2435_p6 = scmp.lt.s32.totalorder %s1855_s27, %s3093_s28 }
 0xc8d   : > { %p2436_p8 = scmp.lt.s32.totalorder %s2434_s16, %s2430_s23 }
 0xc8e   : > { %p2432_p5 = pnand %p2431_p2, %p2664_p3 }
 0xc8f   : > { %p2437_p10 = por %p2436_p8, %p2435_p6 }
 0xc90   : > { %p2433_p4 = pneg %p2432_p5 }
 0xc92   : > { %p2438_p12 = pnand %p2437_p10, %p2433_p4 }
 0xc94   : > { %2441 = shalt.err (!%p2438_p12)
}
 0xc95   : > { %2218 = dma.vmem_to_hbm [thread:$0]  (%p2664_p3), %s1858_s20, 128, %s1855_s27, %s1842_s22  }
 0xc96 PF: > { %s3095_s0 = sld [smem:[#allocation15_spill]]  ;;  %p2240_p0 = scmp.ge.s32.totalorder %s2516_s25, 2 }
 0xc97   : > { %s3096_s21 = sld [smem:[#allocation21_spill]] }
 0xc9c   : > { %s1869_s30 = sand.u32 1, %s3095_s0  }
 0xc9d   : > { %p3097_p1 = scmp.ne.s32.totalorder %s3096_s21, 0  ;;  %s1870_s24 = scalar_lea.sflag [#allocation7], %s1869_s30 }
 0xc9f   : > { %p2231_p7 = pnand %p2240_p0, %p3097_p1 }
 0xca1   : > { %p2232_p9 = pneg %p2231_p7 }
 0xca3   : > { %2483 = dma.done.wait (%p2232_p9), %s1870_s24, 128  }
 0xca4   : > { %2485 = vsyncadd (%p2232_p9), %s1870_s24, 4294967168  ;;  %s30_s25 = sadd.s32 1, %s2516_s25   ;;  %s3098_s23 = sld [smem:[#allocation16_spill]] }
 0xca5   : > { %p27_p11 = scmp.ge.s32.totalorder %s30_s25, 6   ;;  %s3099_s20 = sld [smem:[#allocation22_spill]] }
 0xca6   : > { %s3100_s21 = sld [smem:[#allocation17_spill]]  ;;  %s3104_s18 = smov %s2492_s19 }
 0xca7   : > { %s3101_s22 = sld [smem:[#allocation18_spill]] }
 0xca8   : > { %s3102_s17 = sld [smem:[#allocation19_spill]] }
 0xca9   : > { %s3103_s24 = sld [smem:[#allocation20_spill]] }
 0xcaa   : > { %s3105_s19 = smov %s3098_s23  ;;  %29 = sbr.rel (!%p27_p11) target bundleno = 12 (0xc), region = 133 }
 0xcae   : > { %s3106_s23 = smov %s3102_s17 }
 0xcaf   :  { %1875 = vsyncpa [#allocation6], 1 }
 0xcb0   :  { %1877 = vsyncpa [#allocation6 + $0x1], 1 }
 0xcb1   :  { %1878 = vsyncpa [#allocation9], 1 }
 0xcb2   :  { %1879 = vsyncpa [#allocation7], 1 }
 0xcb3   :  { %1881 = vsyncpa [#allocation7 + $0x1], 1 }

</bundles_post_ra>
